<compile_context>
chip_gen: v6e
topology: v6e:2x2x1
jax: 0.10.0
libtpu: 0.0.40
codegen_flags: <defaults>
</compile_context>

<pallas_src>
import functools

import jax
import jax.numpy as jnp
from jax.experimental import pallas as pl
from jax.experimental.pallas import tpu as pltpu


def _round_up(x, m):
    return ((x + m - 1) // m) * m


def _cdiv(a, b):
    return -(-a // b)


def _padded_tile_bytes(shape, itemsize=4):
    """Bytes a block really occupies in VMEM: last dim rounds to 128 lanes,
    second-to-last to 8 sublanes."""
    shape = tuple(int(d) for d in shape)
    if len(shape) == 1:
        shape = (1,) + shape
    lead = 1
    for d in shape[:-2]:
        lead *= d
    return lead * _round_up(shape[-2], 8) * _round_up(shape[-1], 128) * itemsize


def _choose_tiling(batch, tm_max):
    """Balanced batch tiling: pick the tile count first, then size the tiles,
    so padding stays < 8 rows per tile.  Tile counts > 1 are rounded to an
    even number so v7x's two TensorCores (dimension_semantics="parallel") get
    equal work; the final cdiv guarantees no tile starts past the batch."""
    n_tiles = _cdiv(batch, tm_max)
    if n_tiles == 1 and batch >= 1024:
        n_tiles = 2                      # give v7x's second TC something to do
    if n_tiles > 1 and n_tiles % 2:
        n_tiles += 1
    tm = _round_up(_cdiv(batch, n_tiles), 8)
    n_tiles = _cdiv(batch, tm)           # never schedule a fully-OOB tile
    return n_tiles, tm


def _critic_kernel(x_ref, w1_ref, b1_ref, w2r_ref, b2_ref, o_ref):
    # Layer 1: hidden = relu(x @ W1 + b1)   (MXU matmul, f32 accumulation).
    h = jnp.dot(x_ref[...], w1_ref[...], preferred_element_type=jnp.float32)
    h = jnp.maximum(h + b1_ref[...], 0.0)                      # [tm, Hp]
    # Layer 2 (out_features == 1): value_row[1, tm] = w2_row @ h^T, expressed
    # as a transposed-RHS dot_general so the result comes out lane-dense
    # (batch along lanes) and the store to the (1, 1, tm) output block is a
    # dense vst instead of ~tm/8 masked 4-byte-strided stores.
    v = jax.lax.dot_general(
        w2r_ref[...], h,
        dimension_numbers=(((1,), (1,)), ((), ())),
        preferred_element_type=jnp.float32)                    # [1, tm]
    o_ref[...] = (v + b2_ref[0]).reshape(o_ref.shape).astype(o_ref.dtype)


@functools.partial(jax.jit, static_argnames=("tm_max",))
def critic_forward(state, w1, b1, w2, b2, *, tm_max=2048):
    """state: [B, num_inputs1] f32 -> [B, 1] f32 (matches PyTorch Critic.forward)."""
    B, D = state.shape
    H = w1.shape[1]
    n_tiles, tm = _choose_tiling(B, tm_max)

    # Pad hidden dim to a lane multiple (exact no-op columns), reshape weights
    # for the resident-VMEM layout.  The weights are tiny (D x H), so this is
    # a negligible one-time cost per call.
    Hp = max(_round_up(H, 128), 128)
    w1_p = jnp.zeros((D, Hp), jnp.float32).at[:, :H].set(w1)
    b1_p = jnp.zeros((1, Hp), jnp.float32).at[:, :H].set(b1.reshape(1, H))
    w2_row = jnp.zeros((1, Hp), jnp.float32).at[:, :H].set(w2.reshape(1, H))
    b2_s = b2.reshape(1)

    # VMEM budget from tile-padded shapes: double-buffered state/out blocks,
    # resident weights (assume 2 buffers), f32 hidden intermediates, headroom.
    # Capped at 32 MiB for v7x (64 MiB physical / 32 MiB scoped VMEM).
    vmem_bytes = (
        2 * _padded_tile_bytes((tm, D))            # state tile (double buffered)
        + 2 * _padded_tile_bytes((1, 1, tm))       # output tile (double buffered)
        + 2 * (_padded_tile_bytes((D, Hp))         # W1 resident
               + 2 * _padded_tile_bytes((1, Hp)))  # b1, w2_row resident
        + 2 * _padded_tile_bytes((tm, Hp))         # hidden activations / temps
        + (2 << 20))                               # headroom
    vmem_bytes = int(min(max(vmem_bytes, 4 << 20), 32 << 20))

    out = pl.pallas_call(
        _critic_kernel,
        out_shape=jax.ShapeDtypeStruct((n_tiles, 1, tm), jnp.float32),
        grid=(n_tiles,),
        in_specs=[
            pl.BlockSpec((tm, D), lambda i: (i, 0)),            # state: batch-tiled
            pl.BlockSpec((D, Hp), lambda i: (0, 0)),            # W1: resident
            pl.BlockSpec((1, Hp), lambda i: (0, 0)),            # b1: resident
            pl.BlockSpec((1, Hp), lambda i: (0, 0)),            # w2 row: resident
            pl.BlockSpec(memory_space=pltpu.MemorySpace.SMEM),  # b2 scalar in SMEM
        ],
        out_specs=pl.BlockSpec((1, 1, tm), lambda i: (i, 0, 0)),  # lane-dense rows
        compiler_params=pltpu.CompilerParams(
            dimension_semantics=("parallel",),   # shard batch tiles across v7x TCs
            vmem_limit_bytes=vmem_bytes,
        ),
    )(state, w1_p, b1_p, w2_row, b2_s)

    # (n_tiles, 1, tm) -> flat padded batch -> drop the (< tm) trailing pad rows.
    return out.reshape(-1)[:B].reshape(B, 1)


def init_critic_params(key, num_inputs1, hidden_size):
    """Deterministic init mimicking PyTorch nn.Linear default (U[-1/sqrt(fan_in), +])."""
    k1, k2, k3, k4 = jax.random.split(key, 4)
    bound1 = 1.0 / jnp.sqrt(jnp.float32(num_inputs1))
    bound2 = 1.0 / jnp.sqrt(jnp.float32(hidden_size))
    w1 = jax.random.uniform(k1, (num_inputs1, hidden_size), jnp.float32, -bound1, bound1)
    b1 = jax.random.uniform(k2, (1, hidden_size), jnp.float32, -bound1, bound1)
    w2 = jax.random.uniform(k3, (hidden_size, 1), jnp.float32, -bound2, bound2)
    b2 = jax.random.uniform(k4, (1, 1), jnp.float32, -bound2, bound2)
    return w1, b1, w2, b2


def _reference(state, w1, b1, w2, b2):
    return jnp.maximum(state @ w1 + b1, 0.0) @ w2 + b2


if __name__ == "__main__":
    key = jax.random.PRNGKey(0)
    k_state, k_params, k_big = jax.random.split(key, 3)

    num_inputs1 = 8     # state dimension
    hidden_size = 32
    w1, b1, w2, b2 = init_critic_params(k_params, num_inputs1, hidden_size)

    # Small batch: single tile, basic path.
    batch = 8
    state = jax.random.normal(k_state, (batch, num_inputs1), jnp.float32)
    value = jax.block_until_ready(critic_forward(state, w1, b1, w2, b2))
    ref = _reference(state, w1, b1, w2, b2)
    assert value.shape == (batch, 1)
    assert jnp.allclose(value, ref, atol=1e-4), "small-batch mismatch vs reference"

    # Multi-tile, ragged batch (not a multiple of the tile): exercises the
    # batch grid, resident weights, lane-dense output blocks, balanced tiling,
    # and partial-last-block handling with NO wrapper-side padding.
    big_batch = 300
    state_big = jax.random.normal(k_big, (big_batch, num_inputs1), jnp.float32)
    value_big = jax.block_until_ready(
        critic_forward(state_big, w1, b1, w2, b2, tm_max=128))
    ref_big = _reference(state_big, w1, b1, w2, b2)
    assert value_big.shape == (big_batch, 1)
    assert jnp.allclose(value_big, ref_big, atol=1e-4), "big-batch mismatch vs reference"

    print("KERNEL_OK")
</pallas_src>

<mosaic_0001>
module attributes {stable_mosaic.version = 11 : i64} {
  func.func @_critic_kernel(%arg0: i32, %arg1: memref<8x8xf32, #tpu.memory_space<vmem>>, %arg2: memref<8x128xf32, #tpu.memory_space<vmem>>, %arg3: memref<1x128xf32, #tpu.memory_space<vmem>>, %arg4: memref<1x128xf32, #tpu.memory_space<vmem>>, %arg5: memref<1xf32, #tpu.memory_space<smem>>, %arg6: memref<1x1x8xf32, #tpu.memory_space<vmem>>) attributes {dimension_semantics = [#tpu.dimension_semantics<parallel>], iteration_bounds = array<i64: 1>, scalar_prefetch = 0 : i64, scratch_operands = 0 : i64, tpu.core_type = #tpu.core_type<tc>, window_params = [{transform_indices = @transform_0, window_bounds = array<i64: 8, 8>}, {pipeline_mode = #tpu.pipeline_mode<synchronous>, transform_indices = @transform_1, window_bounds = array<i64: 8, 128>}, {pipeline_mode = #tpu.pipeline_mode<synchronous>, transform_indices = @transform_2, window_bounds = array<i64: 1, 128>}, {pipeline_mode = #tpu.pipeline_mode<synchronous>, transform_indices = @transform_3, window_bounds = array<i64: 1, 128>}, {transform_indices = @transform_4, window_bounds = array<i64: 1>}, {transform_indices = @transform_5, window_bounds = array<i64: 1, 1, 8>}]} {
    %c0 = arith.constant 0 : index
    %c0_0 = arith.constant 0 : index
    %0 = vector.load %arg1[%c0, %c0_0] : memref<8x8xf32, #tpu.memory_space<vmem>>, vector<8x8xf32>
    %c0_1 = arith.constant 0 : index
    %c0_2 = arith.constant 0 : index
    %1 = vector.load %arg2[%c0_1, %c0_2] : memref<8x128xf32, #tpu.memory_space<vmem>>, vector<8x128xf32>
    %cst = arith.constant dense<0.000000e+00> : vector<8x128xf32>
    %2 = tpu.matmul %0, %1, %cst {dimension_numbers = #tpu.dot_dimension_numbers<[1], [0], [0], [1], [0, 0, 1, 1], [], []>} : vector<8x8xf32>, vector<8x128xf32>, vector<8x128xf32> -> vector<8x128xf32>
    %c0_3 = arith.constant 0 : index
    %c0_4 = arith.constant 0 : index
    %3 = vector.load %arg3[%c0_3, %c0_4] : memref<1x128xf32, #tpu.memory_space<vmem>>, vector<1x128xf32>
    %4 = vector.broadcast %3 : vector<1x128xf32> to vector<8x128xf32>
    %5 = arith.addf %2, %4 : vector<8x128xf32>
    %cst_5 = arith.constant 0.000000e+00 : f32
    %6 = vector.broadcast %cst_5 : f32 to vector<8x128xf32>
    %7 = arith.maximumf %5, %6 : vector<8x128xf32>
    %c0_6 = arith.constant 0 : index
    %c0_7 = arith.constant 0 : index
    %8 = vector.load %arg4[%c0_6, %c0_7] : memref<1x128xf32, #tpu.memory_space<vmem>>, vector<1x128xf32>
    %cst_8 = arith.constant dense<0.000000e+00> : vector<1x8xf32>
    %9 = tpu.matmul %8, %7, %cst_8 {dimension_numbers = #tpu.dot_dimension_numbers<[1], [1], [0], [0], [0, 0, 1, 0], [], []>} : vector<1x128xf32>, vector<8x128xf32>, vector<1x8xf32> -> vector<1x8xf32>
    %c0_9 = arith.constant 0 : index
    %10 = memref.load %arg5[%c0_9] : memref<1xf32, #tpu.memory_space<smem>>
    %11 = vector.broadcast %10 : f32 to vector<1x8xf32>
    %12 = arith.addf %9, %11 : vector<1x8xf32>
    %13 = vector.shape_cast %12 : vector<1x8xf32> to vector<1x1x8xf32>
    %c0_10 = arith.constant 0 : index
    %c0_11 = arith.constant 0 : index
    %c0_12 = arith.constant 0 : index
    %14 = vector.load %arg6[%c0_10, %c0_11, %c0_12] : memref<1x1x8xf32, #tpu.memory_space<vmem>>, vector<1x1x8xf32>
    tpu.vector_store %arg6[%c0_10, %c0_11, %c0_12], %13 {strides = array<i32>} : memref<1x1x8xf32, #tpu.memory_space<vmem>>, vector<1x1x8xf32>,
    return
  }
  func.func @transform_0(%arg0: i32) -> (i32, i32) {
    %c0_i32 = arith.constant 0 : i32
    %c0_i32_0 = arith.constant 0 : i32
    return %arg0, %c0_i32 : i32, i32
  }
  func.func @transform_1(%arg0: i32) -> (i32, i32) {
    %c0_i32 = arith.constant 0 : i32
    %c0_i32_0 = arith.constant 0 : i32
    %c0_i32_1 = arith.constant 0 : i32
    return %c0_i32, %c0_i32_0 : i32, i32
  }
  func.func @transform_2(%arg0: i32) -> (i32, i32) {
    %c0_i32 = arith.constant 0 : i32
    %c0_i32_0 = arith.constant 0 : i32
    %c0_i32_1 = arith.constant 0 : i32
    return %c0_i32, %c0_i32_0 : i32, i32
  }
  func.func @transform_3(%arg0: i32) -> (i32, i32) {
    %c0_i32 = arith.constant 0 : i32
    %c0_i32_0 = arith.constant 0 : i32
    %c0_i32_1 = arith.constant 0 : i32
    return %c0_i32, %c0_i32_0 : i32, i32
  }
  func.func @transform_4(%arg0: i32) -> i32 {
    %c0_i32 = arith.constant 0 : i32
    %c0_i32_0 = arith.constant 0 : i32
    return %c0_i32 : i32
  }
  func.func @transform_5(%arg0: i32) -> (i32, i32, i32) {
    %c0_i32 = arith.constant 0 : i32
    %c0_i32_0 = arith.constant 0 : i32
    %c0_i32_1 = arith.constant 0 : i32
    return %arg0, %c0_i32, %c0_i32_0 : i32, i32, i32
  }
}

</mosaic_0001>

<bundles_post_ra>
// kernel: critic_forward.1
= control target key start
LH: loop header
LB: loop body
LE: loop exit
PB: predicated region body
PF: predicated region fallthrough
CT: control target
= control target key end

     0   :  { %vm31_vm0 = vcmask 64512   ;;  %v236_v2 = vmov 0.0   ;;  %vm237_vm1 = vmmov 0   ;;  %s287_s0 = inlined_call_operand.vmem [shape: f32[8,8], index: 0, kind: input, shape index: {}]   ;;  %s288_s1 = inlined_call_operand.vmem [shape: f32[8,128], index: 1, kind: input, shape index: {}]   ;;  %s289_s2 = inlined_call_operand.vmem [shape: f32[1,128], index: 2, kind: input, shape index: {}]   ;;  %s290_s3 = inlined_call_operand.vmem [shape: f32[1,128], index: 3, kind: input, shape index: {}]   ;;  %s291_s4 = inlined_call_operand.<no memory space> [shape: f32[1], index: 4, kind: input, shape index: {}]   ;;  %s292_s5 = inlined_call_operand.hbm [shape: f32[1,1,8], index: 5, kind: output, shape index: {}]  }
   0x1   :  { %v23_v0 = vld [vmem:[%s288_s1] sm:$0xff]  ;;  %201 = vmatprep.subr.mxu0 %v236_v2  ;;  %203 = vmatprep.mubr.msk.f32.mxu0 %vm237_vm1, %v236_v2 }
   0x2   :  { %v22_v1 = vld [vmem:[%s287_s0] sm:$0xff] }
   0x3   :  { %11 = vsyncpa [#allocation4], 0  ;;  %202 = vmatpush3.msra.mxu0 %v23_v0  ;;  %206 = vmatprep.subr.mxu1 %v236_v2  ;;  %v195_v3 = vld [vmem:[%s289_s2] ss:$0 sm:$0xff]  ;;  %v108_v9 = vstv %s291_s4  ;;  %s238_s26 = smov [#allocation3]   ;;  %vm179_vm2 = vcmask 57344  }
   0x4   :  { %204 = vmatmul.mubr.msk.f32.vlgmr.msra.gmra.mxu0 %vm31_vm0, %v22_v1  ;;  %208 = vmatprep.mubr.msk.f32.mxu1 %vm237_vm1, %v236_v2  ;;  %v106_v8 = vld [vmem:[%s290_s3] sm:$0x1]  ;;  %s187_s27 = sshll.u32 %s238_s26, 4  ;;  %s188_s27 = int_to_ptr.vmem [resolvable:$true] %s187_s27 }
   0x5   :  { %s214_s2 = scalar_lea.vmem %s188_s27, 16  ;;  %s218_s28 = scalar_lea.vmem %s188_s27, 32 }
   0x6   :  { %p215_p0 = scmp.ne.s32.totalorder %s188_s27, %s214_s2  ;;  %p219_p1 = scmp.lt.s32.totalorder %s188_s27, %s188_s27 }
   0x7   :  { %p220_p2 = scmp.lt.s32.totalorder %s218_s28, %s214_s2 }
   0x9   :  { %p221_p3 = por %p220_p2, %p219_p1 }
   0xb   :  { %p222_p4 = pnand %p221_p3, %p215_p0 }
  0xc4   :  { %v101_v4 = vpop.f32.mrf.mxu0 }
  0xc5   :  { %v102_v5 = vadd.f32 %v195_v3, %v101_v4 }
  0xc6   :  { %v205_v6 = vpop.f32.mrf.mxu0 }
  0xc7   :  { %v105_v7 = vmax.f32 %v102_v5, 0.0 }
  0xc9   :  { %207 = vmatpush3.xpose.msra.mxu1 %v105_v7 }
  0xcc   :  { %209 = vmatmul.mubr.f32.vlgmr.msra.gmra.mxu1 %v106_v8 }
 0x18c   :  { %v175_v10 = vpop.f32.mrf.mxu1 }
 0x18d   :  { %v176_v11 = vadd.f32 %v175_v10, %v108_v9 }
 0x18e   :  { %v210_v12 = vpop.f32.mrf.mxu1 }
 0x18f   :  { %180 = vst.msk [vmem:[#allocation3] sm:$0x1] %vm179_vm2, %v176_v11 }
 0x190   :  { %225 = shalt.err (!%p222_p4)
}
 0x191   :  { %190 = dma.vmem_to_hbm [thread:$0]  %s188_s27, 16, %s292_s5, [#allocation4]  }
 0x192   :  { %234 = dma.done.wait [#allocation4], 16  }
 0x193   :  { %235 = vsyncadd [#allocation4], 4294967280 }
 0x194   :  { %194 = vsyncpa [#allocation4], 1 }

</bundles_post_ra>
